<compile_context>
chip_gen: v6e
topology: v6e:2x2x1
jax: 0.10.0
libtpu: 0.0.40
codegen_flags: <defaults>
</compile_context>

<pallas_src>
import jax
import jax.numpy as jnp
import numpy as np
from jax import lax
from jax.experimental import pallas as pl
from jax.experimental.pallas import tpu as pltpu

LATDIM = 32                 # args.latdim
LEAKY = 0.1                 # args.leaky (negative slope of LeakyReLU)
_TM_FOLDED = 2048           # folded-row tile per grid step (2 MiB f32 @ 256 lanes)
_FAST_PATH_MAX_ROWS = 256   # below this, plain XLA beats a kernel launch


def _leaky(z):
    return jnp.where(z >= 0, z, LEAKY * z)


def _default_fold():
    """Lane-fold factor: 4 -> 128 lanes (v5 MXU), 8 -> 256 lanes (v6e/v7x MXU)."""
    try:
        dk = jax.devices()[0].device_kind.lower()
    except Exception:
        return 8
    return 4 if "v5" in dk else 8


# ---------------------------------------------------------------------------
# Streaming kernel: out = LeakyReLU(key_folded @ W1_blockdiag + b1_tiled)
# ---------------------------------------------------------------------------
def _mapping_kernel(key_ref, w_ref, b_ref, out_ref):
    z = jnp.dot(key_ref[...], w_ref[...],
                preferred_element_type=jnp.float32) + b_ref[...]
    out_ref[...] = _leaky(z).astype(out_ref.dtype)


# ---------------------------------------------------------------------------
# mapping(key) = LeakyReLU(key @ W1 + b1), lane-dense Pallas streaming path.
# ---------------------------------------------------------------------------
def meta_mapping_apply(key, W1, b1, *, fold=None):
    D = LATDIM
    M = key.shape[0]
    key = key.astype(jnp.float32)
    b1 = b1.reshape(1, D)

    # Small batches: launch + pipeline prologue dominate; fused XLA dot wins.
    if M <= _FAST_PATH_MAX_ROWS:
        z = jnp.dot(key, W1, precision=lax.Precision.HIGHEST) + b1
        return _leaky(z)

    if fold is None:
        fold = _default_fold()
    DF = D * fold

    # Pad rows so they fold evenly into (mf_pad, D*fold) lane-dense rows and
    # tile evenly over the grid (padded rows are computed and discarded).
    m_pad = pl.cdiv(M, fold) * fold
    mf = m_pad // fold
    tm = mf if mf <= _TM_FOLDED else _TM_FOLDED
    mf_pad = pl.cdiv(mf, tm) * tm
    m_total = mf_pad * fold
    if m_total != M:
        key = jnp.pad(key, ((0, m_total - M), (0, 0)))
    key_f = key.reshape(mf_pad, DF)                       # 128/256-lane rows

    # Block-diagonal W1 (fold copies on the diagonal) and tiled bias so the
    # fold is exact: each 32-wide segment of a folded row hits its own W1.
    w_blk = jnp.kron(jnp.eye(fold, dtype=jnp.float32), W1)   # (DF, DF)
    b_rep = jnp.tile(b1, (1, fold))                          # (1, DF)

    grid = (mf_pad // tm,)
    cost = pl.CostEstimate(
        flops=2 * mf_pad * DF * DF + 2 * mf_pad * DF,
        transcendentals=0,
        bytes_accessed=4 * (2 * mf_pad * DF + DF * DF + DF))

    out_f = pl.pallas_call(
        _mapping_kernel,
        out_shape=jax.ShapeDtypeStruct((mf_pad, DF), jnp.float32),
        grid=grid,
        in_specs=[
            pl.BlockSpec((tm, DF), lambda i: (i, 0)),    # streamed key tile
            pl.BlockSpec((DF, DF), lambda i: (0, 0)),    # resident W1 block-diag
            pl.BlockSpec((1, DF), lambda i: (0, 0)),     # resident bias
        ],
        out_specs=pl.BlockSpec((tm, DF), lambda i: (i, 0)),
        compiler_params=pltpu.CompilerParams(
            dimension_semantics=("parallel",)),          # megacore on v7x
        cost_estimate=cost,
    )(key_f, w_blk, b_rep)

    return out_f.reshape(m_total, D)[:M]


# ---------------------------------------------------------------------------
# Parameter preparation (one-time, host side) from PyTorch-layout weights.
# ---------------------------------------------------------------------------
def prepare_params(linear1_w, linear1_b, linear2_w, linear2_b):
    """linear1_w: [D*D, D], linear1_b: [D*D], linear2_w: [D, D], linear2_b: [D]
    (PyTorch nn.Linear layout: weight is [out, in])."""
    D = LATDIM
    return {
        "w1t": jnp.asarray(linear1_w, jnp.float32).T,            # (D, D*D)
        "b1row": jnp.asarray(linear1_b, jnp.float32).reshape(1, D * D),
        "w2t": jnp.asarray(linear2_w, jnp.float32).T,            # (D, D)
        "b2row": jnp.asarray(linear2_b, jnp.float32).reshape(1, D),
    }


# ---------------------------------------------------------------------------
# Meta.forward: compute W1/b1 once (tiny, plain XLA), return the mapping.
# ---------------------------------------------------------------------------
def meta_forward(hyper, params, *, fold=None):
    D = LATDIM
    hp = lax.Precision.HIGHEST
    hm = jnp.mean(hyper.astype(jnp.float32), axis=0, keepdims=True)   # (1, D)
    W1 = (jnp.dot(hm, params["w1t"], precision=hp)
          + params["b1row"]).reshape(D, D)                            # (D, D)
    b1 = jnp.dot(hm, params["w2t"], precision=hp) + params["b2row"]   # (1, D)

    def mapping(key_rows):
        return meta_mapping_apply(key_rows, W1, b1, fold=fold)
    return mapping


# ---------------------------------------------------------------------------
# Pure JAX reference (PyTorch math, PyTorch weight layout).
# ---------------------------------------------------------------------------
def reference(hyper, key_rows, linear1_w, linear1_b, linear2_w, linear2_b):
    D = LATDIM
    hp = lax.Precision.HIGHEST
    hm = jnp.mean(hyper, axis=0, keepdims=True)
    W1 = (jnp.dot(hm, linear1_w.T, precision=hp) + linear1_b).reshape(D, D)
    b1 = jnp.dot(hm, linear2_w.T, precision=hp) + linear2_b
    z = jnp.dot(key_rows, W1, precision=hp) + b1
    return _leaky(z)


if __name__ == "__main__":
    D = LATDIM
    N = 8          # hyper rows
    M_small = 64   # exercises the small-batch XLA fast path
    M_large = 1024 # exercises the Pallas streaming kernel

    rng = jax.random.PRNGKey(0)
    k_hyper, k_key1, k_key2, k_w1, k_b1, k_w2, k_b2 = jax.random.split(rng, 7)

    hyper = jax.random.normal(k_hyper, (N, D), dtype=jnp.float32)
    key_small = jax.random.normal(k_key1, (M_small, D), dtype=jnp.float32)
    key_large = jax.random.normal(k_key2, (M_large, D), dtype=jnp.float32)

    # Deterministic "parameters" in PyTorch nn.Linear layout ([out, in]).
    linear1_w = 0.05 * jax.random.normal(k_w1, (D * D, D), dtype=jnp.float32)
    linear1_b = 0.05 * jax.random.normal(k_b1, (D * D,), dtype=jnp.float32)
    linear2_w = 0.05 * jax.random.normal(k_w2, (D, D), dtype=jnp.float32)
    linear2_b = 0.05 * jax.random.normal(k_b2, (D,), dtype=jnp.float32)

    params = prepare_params(linear1_w, linear1_b, linear2_w, linear2_b)

    mapping = meta_forward(hyper, params)          # == Meta.forward(hyper)

    out_small = jax.block_until_ready(mapping(key_small))   # XLA fast path
    out_large = jax.block_until_ready(mapping(key_large))   # Pallas kernel

    ref_small = reference(hyper, key_small,
                          linear1_w, linear1_b, linear2_w, linear2_b)
    ref_large = reference(hyper, key_large,
                          linear1_w, linear1_b, linear2_w, linear2_b)

    np.testing.assert_allclose(np.asarray(out_small), np.asarray(ref_small),
                               rtol=1e-5, atol=1e-5)
    np.testing.assert_allclose(np.asarray(out_large), np.asarray(ref_large),
                               rtol=1e-5, atol=1e-5)
    print("KERNEL_OK")
</pallas_src>

<mosaic_0001>
module attributes {stable_mosaic.version = 11 : i64} {
  func.func @_mapping_kernel(%arg0: i32, %arg1: memref<128x256xf32, #tpu.memory_space<vmem>>, %arg2: memref<256x256xf32, #tpu.memory_space<vmem>>, %arg3: memref<1x256xf32, #tpu.memory_space<vmem>>, %arg4: memref<128x256xf32, #tpu.memory_space<vmem>>) attributes {dimension_semantics = [#tpu.dimension_semantics<parallel>], iteration_bounds = array<i64: 1>, scalar_prefetch = 0 : i64, scratch_operands = 0 : i64, tpu.core_type = #tpu.core_type<tc>, window_params = [{transform_indices = @transform_0, window_bounds = array<i64: 128, 256>}, {pipeline_mode = #tpu.pipeline_mode<synchronous>, transform_indices = @transform_1, window_bounds = array<i64: 256, 256>}, {pipeline_mode = #tpu.pipeline_mode<synchronous>, transform_indices = @transform_2, window_bounds = array<i64: 1, 256>}, {transform_indices = @transform_3, window_bounds = array<i64: 128, 256>}]} {
    %c0 = arith.constant 0 : index
    %c0_0 = arith.constant 0 : index
    %0 = vector.load %arg1[%c0, %c0_0] : memref<128x256xf32, #tpu.memory_space<vmem>>, vector<128x256xf32>
    %c0_1 = arith.constant 0 : index
    %c0_2 = arith.constant 0 : index
    %1 = vector.load %arg2[%c0_1, %c0_2] : memref<256x256xf32, #tpu.memory_space<vmem>>, vector<256x256xf32>
    %cst = arith.constant dense<0.000000e+00> : vector<128x256xf32>
    %2 = tpu.matmul %0, %1, %cst {dimension_numbers = #tpu.dot_dimension_numbers<[1], [0], [0], [1], [0, 0, 1, 1], [], []>} : vector<128x256xf32>, vector<256x256xf32>, vector<128x256xf32> -> vector<128x256xf32>
    %c0_3 = arith.constant 0 : index
    %c0_4 = arith.constant 0 : index
    %3 = vector.load %arg3[%c0_3, %c0_4] : memref<1x256xf32, #tpu.memory_space<vmem>>, vector<1x256xf32>
    %4 = vector.broadcast %3 : vector<1x256xf32> to vector<128x256xf32>
    %5 = arith.addf %2, %4 : vector<128x256xf32>
    %cst_5 = arith.constant 0.000000e+00 : f32
    %6 = vector.broadcast %cst_5 : f32 to vector<128x256xf32>
    %7 = arith.cmpf oge, %5, %6 : vector<128x256xf32>
    %cst_6 = arith.constant 1.000000e-01 : f32
    %8 = vector.broadcast %cst_6 : f32 to vector<128x256xf32>
    %9 = arith.mulf %8, %5 : vector<128x256xf32>
    %10 = arith.select %7, %5, %9 : vector<128x256xi1>, vector<128x256xf32>
    %c0_7 = arith.constant 0 : index
    %c0_8 = arith.constant 0 : index
    %11 = vector.load %arg4[%c0_7, %c0_8] : memref<128x256xf32, #tpu.memory_space<vmem>>, vector<128x256xf32>
    tpu.vector_store %arg4[%c0_7, %c0_8], %10 {strides = array<i32>} : memref<128x256xf32, #tpu.memory_space<vmem>>, vector<128x256xf32>,
    return
  }
  func.func @transform_0(%arg0: i32) -> (i32, i32) {
    %c0_i32 = arith.constant 0 : i32
    %c0_i32_0 = arith.constant 0 : i32
    return %arg0, %c0_i32 : i32, i32
  }
  func.func @transform_1(%arg0: i32) -> (i32, i32) {
    %c0_i32 = arith.constant 0 : i32
    %c0_i32_0 = arith.constant 0 : i32
    %c0_i32_1 = arith.constant 0 : i32
    return %c0_i32, %c0_i32_0 : i32, i32
  }
  func.func @transform_2(%arg0: i32) -> (i32, i32) {
    %c0_i32 = arith.constant 0 : i32
    %c0_i32_0 = arith.constant 0 : i32
    %c0_i32_1 = arith.constant 0 : i32
    return %c0_i32, %c0_i32_0 : i32, i32
  }
  func.func @transform_3(%arg0: i32) -> (i32, i32) {
    %c0_i32 = arith.constant 0 : i32
    %c0_i32_0 = arith.constant 0 : i32
    return %arg0, %c0_i32 : i32, i32
  }
}

</mosaic_0001>

<bundles_post_ra>
// kernel: tpu_custom_call.1
= control target key start
LH: loop header
LB: loop body
LE: loop exit
PB: predicated region body
PF: predicated region fallthrough
CT: control target
= control target key end

     0   :  { %8 = vsyncpa [#allocation3], 0  ;;  %s675_s0 = inlined_call_operand.hbm [shape: f32[128,256], index: 0, kind: input, shape index: {}]   ;;  %s676_s1 = inlined_call_operand.hbm [shape: f32[256,256], index: 1, kind: input, shape index: {}]   ;;  %s677_s2 = inlined_call_operand.vmem [shape: f32[1,256], index: 2, kind: input, shape index: {}]   ;;  %s678_s3 = inlined_call_operand.hbm [shape: f32[128,256], index: 3, kind: output, shape index: {}]  }
   0x1   :  { %9 = vsyncpa [#allocation6], 0 }
   0x2   :  { %10 = vsyncpa [#allocation4], 0  ;;  %s593_s12 = smov [#allocation2]  }
   0x3   :  { %s16_s13 = sshll.u32 %s593_s12, 4  ;;  %s17_s13 = int_to_ptr.vmem [resolvable:$true] %s16_s13 }
   0x4   :  { %s535_s14 = scalar_lea.vmem %s17_s13, 4096  ;;  %p540_p1 = scmp.lt.s32.totalorder %s17_s13, %s17_s13 }
   0x5   :  { %p536_p0 = scmp.ne.s32.totalorder %s17_s13, %s535_s14  ;;  %p541_p2 = scmp.lt.s32.totalorder %s535_s14, %s535_s14 }
   0x7   :  { %p542_p3 = por %p541_p2, %p540_p1 }
   0x9   :  { %p543_p4 = pnand %p542_p3, %p536_p0 }
   0xb   :  { %546 = shalt.err (!%p543_p4)
}
   0xc   :  { %s594_s15 = smov 256   ;;  %s595_s16 = smov 16  }
   0xd   :  { %22 = dma.hbm_to_vmem [thread:$0]  %s675_s0, 4096, %s17_s13, [#allocation3], %s594_s15, %s594_s15, %s595_s16  }
   0xe   :  { %s596_s19 = smov [#allocation5]  }
   0xf   :  { %s28_s20 = sshll.u32 %s596_s19, 4  ;;  %s29_s20 = int_to_ptr.vmem [resolvable:$true] %s28_s20 }
  0x10   :  { %s555_s21 = scalar_lea.vmem %s29_s20, 8192  ;;  %p560_p6 = scmp.lt.s32.totalorder %s29_s20, %s29_s20 }
  0x11   :  { %p556_p5 = scmp.ne.s32.totalorder %s29_s20, %s555_s21  ;;  %p561_p7 = scmp.lt.s32.totalorder %s555_s21, %s555_s21 }
  0x13   :  { %p562_p8 = por %p561_p7, %p560_p6 }
  0x15   :  { %p563_p9 = pnand %p562_p8, %p556_p5 }
  0x17   :  { %566 = shalt.err (!%p563_p9)
}
  0x18   :  { %34 = dma.hbm_to_vmem [thread:$0]  %s676_s1, 8192, %s29_s20, [#allocation6], %s594_s15, %s594_s15, %s595_s16  }
  0x19   :  { %587 = dma.done.wait [#allocation3], 4096  }
  0x1a   :  { %588 = vsyncadd [#allocation3], 4294963200 }
  0x1b   :  { %589 = dma.done.wait [#allocation6], 8192  }
  0x1c   :  { %590 = vsyncadd [#allocation6], 4294959104  ;;  %v106_v0 = vld [vmem:[#allocation5 + $0xf8] sm:$0xff]  ;;  %v105_v1 = vld [vmem:[#allocation5 + $0xf0] sm:$0xff] }
  0x1d   :  { %v104_v2 = vld [vmem:[#allocation5 + $0xe8] sm:$0xff]  ;;  %151 = vmatprep.subr.mxu0 %v106_v0  ;;  %458 = vmatprep.subr.mxu1 %v106_v0  ;;  %v103_v3 = vld [vmem:[#allocation5 + $0xe0] sm:$0xff]  ;;  %v102_v4 = vld [vmem:[#allocation5 + $0xd8] sm:$0xff] }
  0x1e   :  { %152 = vmatpush1.msra.mxu0 %v105_v1  ;;  %490 = vmatpush1.msra.mxu1 %v105_v1  ;;  %v101_v5 = vld [vmem:[#allocation5 + $0xd0] sm:$0xff]  ;;  %v100_v6 = vld [vmem:[#allocation5 + $0xc8] sm:$0xff]  ;;  %v99_v7 = vld [vmem:[#allocation5 + $0xc0] sm:$0xff] }
  0x1f   :  { %153 = vmatprep.subr.mxu0 %v104_v2  ;;  %459 = vmatprep.subr.mxu1 %v104_v2  ;;  %v98_v8 = vld [vmem:[#allocation5 + $0xb8] sm:$0xff]  ;;  %v97_v9 = vld [vmem:[#allocation5 + $0xb0] sm:$0xff]  ;;  %v96_v10 = vld [vmem:[#allocation5 + $0xa8] sm:$0xff] }
  0x20   :  { %154 = vmatpush1.msra.mxu0 %v103_v3  ;;  %491 = vmatpush1.msra.mxu1 %v103_v3  ;;  %v95_v11 = vld [vmem:[#allocation5 + $0xa0] sm:$0xff]  ;;  %v94_v12 = vld [vmem:[#allocation5 + $0x98] sm:$0xff]  ;;  %v93_v13 = vld [vmem:[#allocation5 + $0x90] sm:$0xff] }
  0x21   :  { %155 = vmatprep.subr.mxu0 %v102_v4  ;;  %460 = vmatprep.subr.mxu1 %v102_v4  ;;  %v92_v14 = vld [vmem:[#allocation5 + $0x88] sm:$0xff]  ;;  %v91_v15 = vld [vmem:[#allocation5 + $0x80] sm:$0xff]  ;;  %v90_v16 = vld [vmem:[#allocation5 + $0x78] sm:$0xff] }
  0x22   :  { %156 = vmatpush1.msra.mxu0 %v101_v5  ;;  %492 = vmatpush1.msra.mxu1 %v101_v5  ;;  %v89_v17 = vld [vmem:[#allocation5 + $0x70] sm:$0xff]  ;;  %v88_v18 = vld [vmem:[#allocation5 + $0x68] sm:$0xff]  ;;  %v87_v19 = vld [vmem:[#allocation5 + $0x60] sm:$0xff] }
  0x23   :  { %157 = vmatprep.subr.mxu0 %v100_v6  ;;  %461 = vmatprep.subr.mxu1 %v100_v6  ;;  %v86_v20 = vld [vmem:[#allocation5 + $0x58] sm:$0xff]  ;;  %v85_v21 = vld [vmem:[#allocation5 + $0x50] sm:$0xff]  ;;  %v84_v22 = vld [vmem:[#allocation5 + $0x48] sm:$0xff] }
  0x24   :  { %158 = vmatpush1.msra.mxu0 %v99_v7  ;;  %493 = vmatpush1.msra.mxu1 %v99_v7  ;;  %v83_v23 = vld [vmem:[#allocation5 + $0x40] sm:$0xff]  ;;  %v82_v24 = vld [vmem:[#allocation5 + $0x38] sm:$0xff]  ;;  %v81_v25 = vld [vmem:[#allocation5 + $0x30] sm:$0xff] }
  0x25   :  { %159 = vmatprep.subr.mxu0 %v98_v8  ;;  %462 = vmatprep.subr.mxu1 %v98_v8  ;;  %v80_v26 = vld [vmem:[#allocation5 + $0x28] sm:$0xff]  ;;  %v79_v27 = vld [vmem:[#allocation5 + $0x20] sm:$0xff]  ;;  %v78_v28 = vld [vmem:[#allocation5 + $0x18] sm:$0xff] }
  0x26   :  { %160 = vmatpush1.msra.mxu0 %v97_v9  ;;  %494 = vmatpush1.msra.mxu1 %v97_v9  ;;  %v77_v29 = vld [vmem:[#allocation5 + $0x10] sm:$0xff]  ;;  %v76_v30 = vld [vmem:[#allocation5 + $0x8] sm:$0xff]  ;;  %v75_v31 = vld [vmem:[#allocation5] sm:$0xff] }
  0x27   :  { %161 = vmatprep.subr.mxu0 %v96_v10  ;;  %463 = vmatprep.subr.mxu1 %v96_v10  ;;  %v138_v32 = vld [vmem:[#allocation5 + $0x1f8] sm:$0xff]  ;;  %v137_v33 = vld [vmem:[#allocation5 + $0x1f0] sm:$0xff]  ;;  %v136_v34 = vld [vmem:[#allocation5 + $0x1e8] sm:$0xff] }
  0x28   :  { %162 = vmatpush1.msra.mxu0 %v95_v11  ;;  %495 = vmatpush1.msra.mxu1 %v95_v11  ;;  %v135_v35 = vld [vmem:[#allocation5 + $0x1e0] sm:$0xff]  ;;  %v134_v36 = vld [vmem:[#allocation5 + $0x1d8] sm:$0xff]  ;;  %v133_v37 = vld [vmem:[#allocation5 + $0x1d0] sm:$0xff] }
  0x29   :  { %163 = vmatprep.subr.mxu0 %v94_v12  ;;  %464 = vmatprep.subr.mxu1 %v94_v12  ;;  %v132_v38 = vld [vmem:[#allocation5 + $0x1c8] sm:$0xff]  ;;  %v131_v39 = vld [vmem:[#allocation5 + $0x1c0] sm:$0xff]  ;;  %v130_v40 = vld [vmem:[#allocation5 + $0x1b8] sm:$0xff] }
  0x2a   :  { %164 = vmatpush1.msra.mxu0 %v93_v13  ;;  %496 = vmatpush1.msra.mxu1 %v93_v13  ;;  %v129_v41 = vld [vmem:[#allocation5 + $0x1b0] sm:$0xff]  ;;  %v128_v42 = vld [vmem:[#allocation5 + $0x1a8] sm:$0xff]  ;;  %v127_v43 = vld [vmem:[#allocation5 + $0x1a0] sm:$0xff] }
  0x2b   :  { %165 = vmatprep.subr.mxu0 %v92_v14  ;;  %465 = vmatprep.subr.mxu1 %v92_v14  ;;  %v126_v44 = vld [vmem:[#allocation5 + $0x198] sm:$0xff]  ;;  %v125_v45 = vld [vmem:[#allocation5 + $0x190] sm:$0xff]  ;;  %v124_v46 = vld [vmem:[#allocation5 + $0x188] sm:$0xff] }
  0x2c   :  { %166 = vmatpush1.msra.mxu0 %v91_v15  ;;  %497 = vmatpush1.msra.mxu1 %v91_v15  ;;  %v123_v47 = vld [vmem:[#allocation5 + $0x180] sm:$0xff]  ;;  %v122_v48 = vld [vmem:[#allocation5 + $0x178] sm:$0xff]  ;;  %v121_v49 = vld [vmem:[#allocation5 + $0x170] sm:$0xff] }
  0x2d   :  { %167 = vmatprep.subr.mxu0 %v90_v16  ;;  %466 = vmatprep.subr.mxu1 %v90_v16  ;;  %v120_v50 = vld [vmem:[#allocation5 + $0x168] sm:$0xff]  ;;  %v119_v51 = vld [vmem:[#allocation5 + $0x160] sm:$0xff]  ;;  %v118_v52 = vld [vmem:[#allocation5 + $0x158] sm:$0xff] }
  0x2e   :  { %168 = vmatpush1.msra.mxu0 %v89_v17  ;;  %498 = vmatpush1.msra.mxu1 %v89_v17  ;;  %v117_v53 = vld [vmem:[#allocation5 + $0x150] sm:$0xff]  ;;  %v116_v54 = vld [vmem:[#allocation5 + $0x148] sm:$0xff]  ;;  %v115_v55 = vld [vmem:[#allocation5 + $0x140] sm:$0xff] }
  0x2f   :  { %169 = vmatprep.subr.mxu0 %v88_v18  ;;  %467 = vmatprep.subr.mxu1 %v88_v18  ;;  %v114_v56 = vld [vmem:[#allocation5 + $0x138] sm:$0xff]  ;;  %v113_v57 = vld [vmem:[#allocation5 + $0x130] sm:$0xff]  ;;  %v112_v58 = vld [vmem:[#allocation5 + $0x128] sm:$0xff] }
  0x30   :  { %170 = vmatpush1.msra.mxu0 %v87_v19  ;;  %499 = vmatpush1.msra.mxu1 %v87_v19  ;;  %v111_v59 = vld [vmem:[#allocation5 + $0x120] sm:$0xff]  ;;  %v110_v60 = vld [vmem:[#allocation5 + $0x118] sm:$0xff]  ;;  %v109_v61 = vld [vmem:[#allocation5 + $0x110] sm:$0xff] }
  0x31   :  { %171 = vmatprep.subr.mxu0 %v86_v20  ;;  %468 = vmatprep.subr.mxu1 %v86_v20  ;;  %v108_v62 = vld [vmem:[#allocation5 + $0x108] sm:$0xff]  ;;  %v107_v63 = vld [vmem:[#allocation5 + $0x100] sm:$0xff]  ;;  %v46_v4 = vld [vmem:[#allocation2 + $0x18] sm:$0xff] }
  0x32   :  { %172 = vmatpush1.msra.mxu0 %v85_v21  ;;  %500 = vmatpush1.msra.mxu1 %v85_v21  ;;  %v44_v0 = vld [vmem:[#allocation2 + $0x8] sm:$0xff]  ;;  %v43_v2 = vld [vmem:[#allocation2] sm:$0xff]  ;;  %v62_v5 = vld [vmem:[#allocation2 + $0x98] sm:$0xff] }
  0x33   :  { %173 = vmatprep.subr.mxu0 %v84_v22  ;;  %469 = vmatprep.subr.mxu1 %v84_v22  ;;  %v60_v1 = vld [vmem:[#allocation2 + $0x88] sm:$0xff]  ;;  %v59_v3 = vld [vmem:[#allocation2 + $0x80] sm:$0xff]  ;;  %v45_v6 = vld [vmem:[#allocation2 + $0x10] sm:$0xff] }
  0x34   :  { %174 = vmatpush1.msra.mxu0 %v83_v23  ;;  %501 = vmatpush1.msra.mxu1 %v83_v23  ;;  %v61_v7 = vld [vmem:[#allocation2 + $0x90] sm:$0xff]  ;;  %v48_v8 = vld [vmem:[#allocation2 + $0x28] sm:$0xff]  ;;  %v47_v10 = vld [vmem:[#allocation2 + $0x20] sm:$0xff] }
  0x35   :  { %175 = vmatprep.subr.mxu0 %v82_v24  ;;  %470 = vmatprep.subr.mxu1 %v82_v24  ;;  %v64_v9 = vld [vmem:[#allocation2 + $0xa8] sm:$0xff]  ;;  %v63_v11 = vld [vmem:[#allocation2 + $0xa0] sm:$0xff]  ;;  %v50_v12 = vld [vmem:[#allocation2 + $0x38] sm:$0xff] }
  0x36   :  { %176 = vmatpush1.msra.mxu0 %v81_v25  ;;  %502 = vmatpush1.msra.mxu1 %v81_v25  ;;  %v66_v13 = vld [vmem:[#allocation2 + $0xb8] sm:$0xff]  ;;  %v49_v14 = vld [vmem:[#allocation2 + $0x30] sm:$0xff]  ;;  %v52_v16 = vld [vmem:[#allocation2 + $0x48] sm:$0xff] }
  0x37   :  { %177 = vmatprep.subr.mxu0 %v80_v26  ;;  %471 = vmatprep.subr.mxu1 %v80_v26  ;;  %v65_v15 = vld [vmem:[#allocation2 + $0xb0] sm:$0xff]  ;;  %v68_v17 = vld [vmem:[#allocation2 + $0xc8] sm:$0xff]  ;;  %v51_v18 = vld [vmem:[#allocation2 + $0x40] sm:$0xff] }
  0x38   :  { %178 = vmatpush1.msra.mxu0 %v79_v27  ;;  %503 = vmatpush1.msra.mxu1 %v79_v27  ;;  %v67_v19 = vld [vmem:[#allocation2 + $0xc0] sm:$0xff]  ;;  %v54_v20 = vld [vmem:[#allocation2 + $0x58] sm:$0xff]  ;;  %v53_v22 = vld [vmem:[#allocation2 + $0x50] sm:$0xff] }
  0x39   :  { %179 = vmatprep.subr.mxu0 %v78_v28  ;;  %472 = vmatprep.subr.mxu1 %v78_v28  ;;  %v70_v21 = vld [vmem:[#allocation2 + $0xd8] sm:$0xff]  ;;  %v69_v23 = vld [vmem:[#allocation2 + $0xd0] sm:$0xff]  ;;  %v56_v24 = vld [vmem:[#allocation2 + $0x68] sm:$0xff] }
  0x3a   :  { %180 = vmatpush1.msra.mxu0 %v77_v29  ;;  %504 = vmatpush1.msra.mxu1 %v77_v29  ;;  %v72_v25 = vld [vmem:[#allocation2 + $0xe8] sm:$0xff]  ;;  %v55_v26 = vld [vmem:[#allocation2 + $0x60] sm:$0xff]  ;;  %v58_v28 = vld [vmem:[#allocation2 + $0x78] sm:$0xff] }
  0x3b   :  { %181 = vmatprep.subr.mxu0 %v76_v30  ;;  %473 = vmatprep.subr.mxu1 %v76_v30  ;;  %v71_v27 = vld [vmem:[#allocation2 + $0xe0] sm:$0xff]  ;;  %v74_v29 = vld [vmem:[#allocation2 + $0xf8] sm:$0xff]  ;;  %v57_v30 = vld [vmem:[#allocation2 + $0x70] sm:$0xff] }
  0x3c   :  { %182 = vmatpush1.msra.mxu0 %v75_v31  ;;  %505 = vmatpush1.msra.mxu1 %v75_v31  ;;  %v73_v31 = vld [vmem:[#allocation2 + $0xf0] sm:$0xff] }
  0x3d   :  { %183 = vmatprep.subr.mxu0 %v138_v32  ;;  %474 = vmatprep.subr.mxu1 %v138_v32  ;;  %v141_v32 = vlaneseq }
  0x3e   :  { %184 = vmatpush2.msra.mxu0 %v137_v33  ;;  %506 = vmatpush2.msra.mxu1 %v137_v33 }
  0x3f   :  { %185 = vmatprep.subr.mxu0 %v136_v34  ;;  %475 = vmatprep.subr.mxu1 %v136_v34  ;;  %v142_v33 = vshrl.u32 %v141_v32, 7 }
  0x40   :  { %186 = vmatpush2.msra.mxu0 %v135_v35  ;;  %507 = vmatpush2.msra.mxu1 %v135_v35  ;;  %v139_v35 = vld [vmem:[%s677_s2] sm:$0x3]  ;;  %s597_s2 = smov [#allocation7]  }
  0x41   :  { %187 = vmatprep.subr.mxu0 %v134_v36  ;;  %476 = vmatprep.subr.mxu1 %v134_v36  ;;  %v143_v34 = vsub.s32 0, %v142_v33  ;;  %v147_v36 = vsub.s32 1, %v142_v33  ;;  %s445_s24 = sshll.u32 %s597_s2, 4  ;;  %s446_s24 = int_to_ptr.vmem [resolvable:$true] %s445_s24 }
  0x42   :  { %188 = vmatpush2.msra.mxu0 %v133_v37  ;;  %508 = vmatpush2.msra.mxu1 %v133_v37  ;;  %s567_s25 = scalar_lea.vmem %s446_s24, 4096  ;;  %p572_p11 = scmp.lt.s32.totalorder %s446_s24, %s446_s24 }
  0x43   :  { %189 = vmatprep.subr.mxu0 %v132_v38  ;;  %477 = vmatprep.subr.mxu1 %v132_v38  ;;  %v633_v37 = vrot.slane %v139_v35, %v143_v34  ;;  %p568_p10 = scmp.ne.s32.totalorder %s446_s24, %s567_s25  ;;  %p573_p12 = scmp.lt.s32.totalorder %s567_s25, %s567_s25 }
  0x44   :  { %190 = vmatpush2.msra.mxu0 %v131_v39  ;;  %509 = vmatpush2.msra.mxu1 %v131_v39 }
  0x45   :  { %191 = vmatprep.subr.mxu0 %v130_v40  ;;  %478 = vmatprep.subr.mxu1 %v130_v40  ;;  %v635_v40 = vrot.slane %v139_v35, %v147_v36  ;;  %p574_p13 = por %p573_p12, %p572_p11 }
  0x46   :  { %192 = vmatpush2.msra.mxu0 %v129_v41  ;;  %510 = vmatpush2.msra.mxu1 %v129_v41 }
  0x47   :  { %193 = vmatprep.subr.mxu0 %v128_v42  ;;  %479 = vmatprep.subr.mxu1 %v128_v42  ;;  %p575_p0 = pnand %p574_p13, %p568_p10 }
  0x48   :  { %194 = vmatpush2.msra.mxu0 %v127_v43  ;;  %511 = vmatpush2.msra.mxu1 %v127_v43 }
  0x49   :  { %195 = vmatprep.subr.mxu0 %v126_v44  ;;  %480 = vmatprep.subr.mxu1 %v126_v44 }
  0x4a   :  { %196 = vmatpush2.msra.mxu0 %v125_v45  ;;  %512 = vmatpush2.msra.mxu1 %v125_v45 }
  0x4b   :  { %197 = vmatprep.subr.mxu0 %v124_v46  ;;  %481 = vmatprep.subr.mxu1 %v124_v46 }
  0x4c   :  { %198 = vmatpush2.msra.mxu0 %v123_v47  ;;  %513 = vmatpush2.msra.mxu1 %v123_v47 }
  0x4d   :  { %199 = vmatprep.subr.mxu0 %v122_v48  ;;  %482 = vmatprep.subr.mxu1 %v122_v48 }
  0x4e   :  { %200 = vmatpush2.msra.mxu0 %v121_v49  ;;  %514 = vmatpush2.msra.mxu1 %v121_v49 }
  0x4f   :  { %201 = vmatprep.subr.mxu0 %v120_v50  ;;  %483 = vmatprep.subr.mxu1 %v120_v50 }
  0x50   :  { %202 = vmatpush2.msra.mxu0 %v119_v51  ;;  %515 = vmatpush2.msra.mxu1 %v119_v51 }
  0x51   :  { %203 = vmatprep.subr.mxu0 %v118_v52  ;;  %484 = vmatprep.subr.mxu1 %v118_v52 }
  0x52   :  { %204 = vmatpush2.msra.mxu0 %v117_v53  ;;  %516 = vmatpush2.msra.mxu1 %v117_v53 }
  0x53   :  { %205 = vmatprep.subr.mxu0 %v116_v54  ;;  %485 = vmatprep.subr.mxu1 %v116_v54 }
  0x54   :  { %206 = vmatpush2.msra.mxu0 %v115_v55  ;;  %517 = vmatpush2.msra.mxu1 %v115_v55 }
  0x55   :  { %207 = vmatprep.subr.mxu0 %v114_v56  ;;  %486 = vmatprep.subr.mxu1 %v114_v56 }
  0x56   :  { %208 = vmatpush2.msra.mxu0 %v113_v57  ;;  %518 = vmatpush2.msra.mxu1 %v113_v57 }
  0x57   :  { %209 = vmatprep.subr.mxu0 %v112_v58  ;;  %487 = vmatprep.subr.mxu1 %v112_v58 }
  0x58   :  { %210 = vmatpush2.msra.mxu0 %v111_v59  ;;  %519 = vmatpush2.msra.mxu1 %v111_v59 }
  0x59   :  { %211 = vmatprep.subr.mxu0 %v110_v60  ;;  %488 = vmatprep.subr.mxu1 %v110_v60 }
  0x5a   :  { %212 = vmatpush2.msra.mxu0 %v109_v61  ;;  %520 = vmatpush2.msra.mxu1 %v109_v61 }
  0x5b   :  { %213 = vmatprep.subr.mxu0 %v108_v62  ;;  %489 = vmatprep.subr.mxu1 %v108_v62 }
  0x5c   :  { %214 = vmatpush2.msra.mxu0 %v107_v63  ;;  %521 = vmatpush2.msra.mxu1 %v107_v63 }
  0x5d   :  { %215 = vmatprep.mubr.f32.mxu0 %v44_v0  ;;  %263 = vmatprep.mubr.f32.mxu1 %v60_v1 }
  0x5e   :  { %216 = vmatmul.mubr.f32.vlgmr.msra.gmra.mxu0 %v43_v2  ;;  %264 = vmatmul.mubr.f32.vlgmr.msra.gmra.mxu1 %v59_v3 }
  0x5f   :  { %221 = vmatprep.mubr.f32.mxu0 %v46_v4  ;;  %269 = vmatprep.mubr.f32.mxu1 %v62_v5 }
  0x62   :  { %222 = vmatmul.mubr.f32.gmra.mxu0 %v45_v6  ;;  %270 = vmatmul.mubr.f32.gmra.mxu1 %v61_v7 }
  0x63   :  { %227 = vmatprep.mubr.f32.mxu0 %v48_v8  ;;  %275 = vmatprep.mubr.f32.mxu1 %v64_v9 }
  0x66   :  { %228 = vmatmul.mubr.f32.gmra.mxu0 %v47_v10  ;;  %276 = vmatmul.mubr.f32.gmra.mxu1 %v63_v11 }
  0x67   :  { %233 = vmatprep.mubr.f32.mxu0 %v50_v12  ;;  %281 = vmatprep.mubr.f32.mxu1 %v66_v13 }
  0x6a   :  { %234 = vmatmul.mubr.f32.gmra.mxu0 %v49_v14  ;;  %282 = vmatmul.mubr.f32.gmra.mxu1 %v65_v15 }
  0x6b   :  { %239 = vmatprep.mubr.f32.mxu0 %v52_v16  ;;  %287 = vmatprep.mubr.f32.mxu1 %v68_v17 }
  0x6e   :  { %240 = vmatmul.mubr.f32.gmra.mxu0 %v51_v18  ;;  %288 = vmatmul.mubr.f32.gmra.mxu1 %v67_v19 }
  0x6f   :  { %245 = vmatprep.mubr.f32.mxu0 %v54_v20  ;;  %293 = vmatprep.mubr.f32.mxu1 %v70_v21 }
  0x72   :  { %246 = vmatmul.mubr.f32.gmra.mxu0 %v53_v22  ;;  %294 = vmatmul.mubr.f32.gmra.mxu1 %v69_v23 }
  0x73   :  { %251 = vmatprep.mubr.f32.mxu0 %v56_v24  ;;  %299 = vmatprep.mubr.f32.mxu1 %v72_v25 }
  0x76   :  { %252 = vmatmul.mubr.f32.gmra.mxu0 %v55_v26  ;;  %300 = vmatmul.mubr.f32.gmra.mxu1 %v71_v27 }
  0x77   :  { %257 = vmatprep.mubr.f32.mxu0 %v58_v28  ;;  %305 = vmatprep.mubr.f32.mxu1 %v74_v29 }
  0x7a   :  { %258 = vmatmul.mubr.f32.gmra.mxu0 %v57_v30  ;;  %306 = vmatmul.mubr.f32.gmra.mxu1 %v73_v31 }
 0x11e   :  { %v217_v38 = vpop.f32.mrf.mxu0  ;;  %v265_v39 = vpop.f32.mrf.mxu1 }
 0x11f   :  { %v218_v41 = vadd.f32 %v217_v38, %v633_v37  ;;  %v266_v42 = vadd.f32 %v265_v39, %v633_v37 }
 0x120   :  { %v219_v43 = vpop.f32.mrf.mxu0  ;;  %v267_v44 = vpop.f32.mrf.mxu1 }
 0x121   :  { %vm312_vm0 = vcmp.ge.f32.partialorder %v218_v41, 0.0  ;;  %v344_v45 = vmul.f32 0.1, %v218_v41  ;;  %vm328_vm1 = vcmp.ge.f32.partialorder %v266_v42, 0.0  ;;  %v360_v46 = vmul.f32 0.1, %v266_v42 }
 0x122   :  { %v220_v47 = vadd.f32 %v219_v43, %v635_v40  ;;  %v268_v48 = vadd.f32 %v267_v44, %v635_v40  ;;  %v223_v49 = vpop.f32.mrf.mxu0  ;;  %v271_v50 = vpop.f32.mrf.mxu1 }
 0x123   :  { %v376_v51 = vsel %vm312_vm0, %v218_v41, %v344_v45  ;;  %v392_v52 = vsel %vm328_vm1, %v266_v42, %v360_v46  ;;  %v224_v53 = vadd.f32 %v223_v49, %v633_v37  ;;  %v272_v54 = vadd.f32 %v271_v50, %v633_v37 }
 0x124   :  { %408 = vst [vmem:[#allocation7] sm:$0xff] %v376_v51  ;;  %424 = vst [vmem:[#allocation7 + $0x80] sm:$0xff] %v392_v52  ;;  %vm313_vm2 = vcmp.ge.f32.partialorder %v220_v47, 0.0  ;;  %v345_v55 = vmul.f32 0.1, %v220_v47  ;;  %vm329_vm3 = vcmp.ge.f32.partialorder %v268_v48, 0.0  ;;  %v225_v57 = vpop.f32.mrf.mxu0  ;;  %v273_v58 = vpop.f32.mrf.mxu1 }
 0x125   :  { %v361_v56 = vmul.f32 0.1, %v268_v48  ;;  %vm314_vm4 = vcmp.ge.f32.partialorder %v224_v53, 0.0  ;;  %v346_v59 = vmul.f32 0.1, %v224_v53  ;;  %vm330_vm5 = vcmp.ge.f32.partialorder %v272_v54, 0.0 }
 0x126   :  { %v362_v60 = vmul.f32 0.1, %v272_v54  ;;  %v377_v61 = vsel %vm313_vm2, %v220_v47, %v345_v55  ;;  %v226_v63 = vadd.f32 %v225_v57, %v635_v40  ;;  %v274_v0 = vadd.f32 %v273_v58, %v635_v40  ;;  %v229_v1 = vpop.f32.mrf.mxu0  ;;  %v277_v2 = vpop.f32.mrf.mxu1 }
 0x127   :  { %v393_v62 = vsel %vm329_vm3, %v268_v48, %v361_v56  ;;  %409 = vst [vmem:[#allocation7 + $0x8] sm:$0xff] %v377_v61  ;;  %v378_v3 = vsel %vm314_vm4, %v224_v53, %v346_v59  ;;  %v230_v5 = vadd.f32 %v229_v1, %v633_v37  ;;  %v278_v6 = vadd.f32 %v277_v2, %v633_v37 }
 0x128   :  { %425 = vst [vmem:[#allocation7 + $0x88] sm:$0xff] %v393_v62  ;;  %v394_v4 = vsel %vm330_vm5, %v272_v54, %v362_v60  ;;  %410 = vst [vmem:[#allocation7 + $0x10] sm:$0xff] %v378_v3  ;;  %vm315_vm6 = vcmp.ge.f32.partialorder %v226_v63, 0.0  ;;  %v347_v7 = vmul.f32 0.1, %v226_v63  ;;  %vm331_vm7 = vcmp.ge.f32.partialorder %v274_v0, 0.0  ;;  %v231_v9 = vpop.f32.mrf.mxu0  ;;  %v279_v10 = vpop.f32.mrf.mxu1 }
 0x129   :  { %426 = vst [vmem:[#allocation7 + $0x90] sm:$0xff] %v394_v4  ;;  %v363_v8 = vmul.f32 0.1, %v274_v0  ;;  %vm316_vm8 = vcmp.ge.f32.partialorder %v230_v5, 0.0  ;;  %v348_v11 = vmul.f32 0.1, %v230_v5  ;;  %v232_v15 = vadd.f32 %v231_v9, %v635_v40 }
 0x12a   :  { %vm332_vm9 = vcmp.ge.f32.partialorder %v278_v6, 0.0  ;;  %v364_v12 = vmul.f32 0.1, %v278_v6  ;;  %v379_v13 = vsel %vm315_vm6, %v226_v63, %v347_v7  ;;  %v280_v16 = vadd.f32 %v279_v10, %v635_v40  ;;  %v235_v17 = vpop.f32.mrf.mxu0  ;;  %v283_v18 = vpop.f32.mrf.mxu1 }
 0x12b   :  { %v395_v14 = vsel %vm331_vm7, %v274_v0, %v363_v8  ;;  %411 = vst [vmem:[#allocation7 + $0x18] sm:$0xff] %v379_v13  ;;  %v380_v19 = vsel %vm316_vm8, %v230_v5, %v348_v11  ;;  %v236_v21 = vadd.f32 %v235_v17, %v633_v37  ;;  %v284_v22 = vadd.f32 %v283_v18, %v633_v37 }
 0x12c   :  { %427 = vst [vmem:[#allocation7 + $0x98] sm:$0xff] %v395_v14  ;;  %v396_v20 = vsel %vm332_vm9, %v278_v6, %v364_v12  ;;  %412 = vst [vmem:[#allocation7 + $0x20] sm:$0xff] %v380_v19  ;;  %vm317_vm10 = vcmp.ge.f32.partialorder %v232_v15, 0.0  ;;  %v349_v23 = vmul.f32 0.1, %v232_v15  ;;  %vm333_vm11 = vcmp.ge.f32.partialorder %v280_v16, 0.0  ;;  %v237_v25 = vpop.f32.mrf.mxu0  ;;  %v285_v26 = vpop.f32.mrf.mxu1 }
 0x12d   :  { %428 = vst [vmem:[#allocation7 + $0xa0] sm:$0xff] %v396_v20  ;;  %v365_v24 = vmul.f32 0.1, %v280_v16  ;;  %vm318_vm12 = vcmp.ge.f32.partialorder %v236_v21, 0.0  ;;  %v350_v27 = vmul.f32 0.1, %v236_v21  ;;  %v238_v31 = vadd.f32 %v237_v25, %v635_v40 }
 0x12e   :  { %vm334_vm13 = vcmp.ge.f32.partialorder %v284_v22, 0.0  ;;  %v366_v28 = vmul.f32 0.1, %v284_v22  ;;  %v381_v29 = vsel %vm317_vm10, %v232_v15, %v349_v23  ;;  %v286_v32 = vadd.f32 %v285_v26, %v635_v40  ;;  %v241_v33 = vpop.f32.mrf.mxu0  ;;  %v289_v34 = vpop.f32.mrf.mxu1 }
 0x12f   :  { %v397_v30 = vsel %vm333_vm11, %v280_v16, %v365_v24  ;;  %413 = vst [vmem:[#allocation7 + $0x28] sm:$0xff] %v381_v29  ;;  %v382_v35 = vsel %vm318_vm12, %v236_v21, %v350_v27  ;;  %v242_v38 = vadd.f32 %v241_v33, %v633_v37  ;;  %v290_v39 = vadd.f32 %v289_v34, %v633_v37 }
 0x130   :  { %429 = vst [vmem:[#allocation7 + $0xa8] sm:$0xff] %v397_v30  ;;  %v398_v36 = vsel %vm334_vm13, %v284_v22, %v366_v28  ;;  %414 = vst [vmem:[#allocation7 + $0x30] sm:$0xff] %v382_v35  ;;  %vm319_vm14 = vcmp.ge.f32.partialorder %v238_v31, 0.0  ;;  %v351_v41 = vmul.f32 0.1, %v238_v31  ;;  %vm335_vm15 = vcmp.ge.f32.partialorder %v286_v32, 0.0  ;;  %v243_v43 = vpop.f32.mrf.mxu0  ;;  %v291_v44 = vpop.f32.mrf.mxu1 }
 0x131   :  { %430 = vst [vmem:[#allocation7 + $0xb0] sm:$0xff] %v398_v36  ;;  %v367_v42 = vmul.f32 0.1, %v286_v32  ;;  %vm320_vm0 = vcmp.ge.f32.partialorder %v242_v38, 0.0  ;;  %v352_v45 = vmul.f32 0.1, %v242_v38  ;;  %v244_v49 = vadd.f32 %v243_v43, %v635_v40 }
 0x132   :  { %vm336_vm1 = vcmp.ge.f32.partialorder %v290_v39, 0.0  ;;  %v368_v46 = vmul.f32 0.1, %v290_v39  ;;  %v383_v47 = vsel %vm319_vm14, %v238_v31, %v351_v41  ;;  %v292_v50 = vadd.f32 %v291_v44, %v635_v40  ;;  %v247_v51 = vpop.f32.mrf.mxu0  ;;  %v295_v52 = vpop.f32.mrf.mxu1 }
 0x133   :  { %v399_v48 = vsel %vm335_vm15, %v286_v32, %v367_v42  ;;  %415 = vst [vmem:[#allocation7 + $0x38] sm:$0xff] %v383_v47  ;;  %v384_v53 = vsel %vm320_vm0, %v242_v38, %v352_v45  ;;  %v248_v55 = vadd.f32 %v247_v51, %v633_v37  ;;  %v296_v56 = vadd.f32 %v295_v52, %v633_v37 }
 0x134   :  { %431 = vst [vmem:[#allocation7 + $0xb8] sm:$0xff] %v399_v48  ;;  %v400_v54 = vsel %vm336_vm1, %v290_v39, %v368_v46  ;;  %416 = vst [vmem:[#allocation7 + $0x40] sm:$0xff] %v384_v53  ;;  %vm321_vm2 = vcmp.ge.f32.partialorder %v244_v49, 0.0  ;;  %v353_v57 = vmul.f32 0.1, %v244_v49  ;;  %vm337_vm3 = vcmp.ge.f32.partialorder %v292_v50, 0.0  ;;  %v249_v59 = vpop.f32.mrf.mxu0  ;;  %v297_v60 = vpop.f32.mrf.mxu1 }
 0x135   :  { %432 = vst [vmem:[#allocation7 + $0xc0] sm:$0xff] %v400_v54  ;;  %v369_v58 = vmul.f32 0.1, %v292_v50  ;;  %vm322_vm4 = vcmp.ge.f32.partialorder %v248_v55, 0.0  ;;  %v354_v61 = vmul.f32 0.1, %v248_v55  ;;  %v250_v1 = vadd.f32 %v249_v59, %v635_v40 }
 0x136   :  { %vm338_vm5 = vcmp.ge.f32.partialorder %v296_v56, 0.0  ;;  %v370_v62 = vmul.f32 0.1, %v296_v56  ;;  %v385_v63 = vsel %vm321_vm2, %v244_v49, %v353_v57  ;;  %v298_v2 = vadd.f32 %v297_v60, %v635_v40  ;;  %v253_v3 = vpop.f32.mrf.mxu0  ;;  %v301_v4 = vpop.f32.mrf.mxu1 }
 0x137   :  { %v401_v0 = vsel %vm337_vm3, %v292_v50, %v369_v58  ;;  %417 = vst [vmem:[#allocation7 + $0x48] sm:$0xff] %v385_v63  ;;  %v386_v5 = vsel %vm322_vm4, %v248_v55, %v354_v61  ;;  %v254_v7 = vadd.f32 %v253_v3, %v633_v37  ;;  %v302_v8 = vadd.f32 %v301_v4, %v633_v37 }
 0x138   :  { %433 = vst [vmem:[#allocation7 + $0xc8] sm:$0xff] %v401_v0  ;;  %v402_v6 = vsel %vm338_vm5, %v296_v56, %v370_v62  ;;  %418 = vst [vmem:[#allocation7 + $0x50] sm:$0xff] %v386_v5  ;;  %vm323_vm6 = vcmp.ge.f32.partialorder %v250_v1, 0.0  ;;  %v355_v9 = vmul.f32 0.1, %v250_v1  ;;  %vm339_vm7 = vcmp.ge.f32.partialorder %v298_v2, 0.0  ;;  %v255_v11 = vpop.f32.mrf.mxu0  ;;  %v303_v12 = vpop.f32.mrf.mxu1 }
 0x139   :  { %434 = vst [vmem:[#allocation7 + $0xd0] sm:$0xff] %v402_v6  ;;  %v371_v10 = vmul.f32 0.1, %v298_v2  ;;  %vm324_vm8 = vcmp.ge.f32.partialorder %v254_v7, 0.0  ;;  %v356_v13 = vmul.f32 0.1, %v254_v7  ;;  %v256_v17 = vadd.f32 %v255_v11, %v635_v40 }
 0x13a   :  { %vm340_vm9 = vcmp.ge.f32.partialorder %v302_v8, 0.0  ;;  %v372_v14 = vmul.f32 0.1, %v302_v8  ;;  %v387_v15 = vsel %vm323_vm6, %v250_v1, %v355_v9  ;;  %v304_v18 = vadd.f32 %v303_v12, %v635_v40  ;;  %v259_v19 = vpop.f32.mrf.mxu0  ;;  %v307_v20 = vpop.f32.mrf.mxu1 }
 0x13b   :  { %v403_v16 = vsel %vm339_vm7, %v298_v2, %v371_v10  ;;  %419 = vst [vmem:[#allocation7 + $0x58] sm:$0xff] %v387_v15  ;;  %v388_v21 = vsel %vm324_vm8, %v254_v7, %v356_v13  ;;  %v260_v23 = vadd.f32 %v259_v19, %v633_v37  ;;  %v308_v24 = vadd.f32 %v307_v20, %v633_v37 }
 0x13c   :  { %435 = vst [vmem:[#allocation7 + $0xd8] sm:$0xff] %v403_v16  ;;  %v404_v22 = vsel %vm340_vm9, %v302_v8, %v372_v14  ;;  %420 = vst [vmem:[#allocation7 + $0x60] sm:$0xff] %v388_v21  ;;  %vm325_vm10 = vcmp.ge.f32.partialorder %v256_v17, 0.0  ;;  %v357_v25 = vmul.f32 0.1, %v256_v17  ;;  %vm341_vm11 = vcmp.ge.f32.partialorder %v304_v18, 0.0  ;;  %v261_v27 = vpop.f32.mrf.mxu0  ;;  %v309_v28 = vpop.f32.mrf.mxu1 }
 0x13d   :  { %436 = vst [vmem:[#allocation7 + $0xe0] sm:$0xff] %v404_v22  ;;  %v373_v26 = vmul.f32 0.1, %v304_v18  ;;  %vm326_vm12 = vcmp.ge.f32.partialorder %v260_v23, 0.0  ;;  %v358_v29 = vmul.f32 0.1, %v260_v23  ;;  %v262_v33 = vadd.f32 %v261_v27, %v635_v40 }
 0x13e   :  { %vm342_vm13 = vcmp.ge.f32.partialorder %v308_v24, 0.0  ;;  %v374_v30 = vmul.f32 0.1, %v308_v24  ;;  %v389_v31 = vsel %vm325_vm10, %v256_v17, %v357_v25  ;;  %v310_v34 = vadd.f32 %v309_v28, %v635_v40 }
 0x13f   :  { %v405_v32 = vsel %vm341_vm11, %v304_v18, %v373_v26  ;;  %421 = vst [vmem:[#allocation7 + $0x68] sm:$0xff] %v389_v31  ;;  %v390_v37 = vsel %vm326_vm12, %v260_v23, %v358_v29  ;;  %vm327_vm14 = vcmp.ge.f32.partialorder %v262_v33, 0.0  ;;  %v359_v36 = vmul.f32 0.1, %v262_v33 }
 0x140   :  { %437 = vst [vmem:[#allocation7 + $0xe8] sm:$0xff] %v405_v32  ;;  %v406_v35 = vsel %vm342_vm13, %v308_v24, %v374_v30  ;;  %422 = vst [vmem:[#allocation7 + $0x70] sm:$0xff] %v390_v37  ;;  %vm343_vm15 = vcmp.ge.f32.partialorder %v310_v34, 0.0  ;;  %v375_v38 = vmul.f32 0.1, %v310_v34 }
 0x141   :  { %438 = vst [vmem:[#allocation7 + $0xf0] sm:$0xff] %v406_v35  ;;  %v391_v39 = vsel %vm327_vm14, %v262_v33, %v359_v36 }
 0x142   :  { %v407_v41 = vsel %vm343_vm15, %v310_v34, %v375_v38  ;;  %423 = vst [vmem:[#allocation7 + $0x78] sm:$0xff] %v391_v39 }
 0x143   :  { %439 = vst [vmem:[#allocation7 + $0xf8] sm:$0xff] %v407_v41 }
 0x144   :  { %578 = shalt.err (!%p575_p0)
}
 0x145   :  { %451 = dma.vmem_to_hbm [thread:$0]  %s446_s24, 4096, %s678_s3, [#allocation4], %s594_s15, %s594_s15, %s595_s16  }
 0x146   :  { %591 = dma.done.wait [#allocation4], 4096  }
 0x147   :  { %592 = vsyncadd [#allocation4], 4294963200 }
 0x148   :  { %455 = vsyncpa [#allocation3], 1 }
 0x149   :  { %456 = vsyncpa [#allocation6], 1 }
 0x14a   :  { %457 = vsyncpa [#allocation4], 1 }

</bundles_post_ra>
